<compile_context>
chip_gen: v5e
topology: v5e:2x2
jax: 0.10.0
libtpu: 0.0.40
codegen_flags: <defaults>
</compile_context>

<pallas_src>
import functools

import jax
import jax.numpy as jnp
from jax.experimental import pallas as pl
from jax.experimental.pallas import tpu as pltpu

_LANES = 128


def _round_up(x, m):
    return (x + m - 1) // m * m


def _actor_critic_kernel(x_ref, w1_ref, b1_ref, w2_ref, b2_ref, wpf_ref, bpf_ref,
                         out_ref, m_sc, l_sc, *, out_size, valid_rows, tile_rows):
    p = pl.program_id(0)      # 0 = accumulate softmax stats, 1 = write outputs
    t = pl.program_id(1)      # batch tile index

    # Forward compute (tiny; recomputed in both passes). MXU matmuls with f32 accum.
    # TODO(synk): cast x / weights to bf16 for the MXU once hidden >= 256 (keep the
    #             elementwise math in f32, especially on v5e).
    x = x_ref[...]
    h = jnp.dot(x, w1_ref[...], preferred_element_type=jnp.float32) + b1_ref[...]
    h = jnp.maximum(h, 0.0)
    h = jnp.dot(h, w2_ref[...], preferred_element_type=jnp.float32) + b2_ref[...]
    h = jnp.maximum(h, 0.0)
    # Fused heads: lanes [0:out_size) = policy logits, lane out_size = value,
    # lanes > out_size = zero padding.
    logits = jnp.dot(h, wpf_ref[...], preferred_element_type=jnp.float32) + bpf_ref[...]

    # Rows past the true batch size are padding; they must not contribute to the
    # batch-axis (sublane) softmax statistics.
    row = jax.lax.broadcasted_iota(jnp.int32, logits.shape, 0) + t * tile_rows
    row_valid = row < valid_rows

    @pl.when(jnp.logical_and(p == 0, t == 0))
    def _():
        m_sc[...] = jnp.full_like(m_sc, -jnp.inf)
        l_sc[...] = jnp.zeros_like(l_sc)

    @pl.when(p == 0)
    def _():
        # Online (flash-style) max / sum-exp accumulation across batch tiles,
        # independently per lane. Pass-0 output writebacks carry don't-care data
        # that pass 1 overwrites.
        masked = jnp.where(row_valid, logits, -jnp.inf)
        tile_max = jnp.max(masked, axis=0, keepdims=True)             # (1, 128)
        m_new = jnp.maximum(m_sc[...], tile_max)
        l_sc[...] = (l_sc[...] * jnp.exp(m_sc[...] - m_new)
                     + jnp.sum(jnp.exp(masked - m_new), axis=0, keepdims=True))
        m_sc[...] = m_new

    @pl.when(p == 1)
    def _():
        lse = m_sc[...] + jnp.log(l_sc[...])                           # (1, 128)
        lane = jax.lax.broadcasted_iota(jnp.int32, logits.shape, 1)
        is_val_lane = lane == out_size
        # val lane stays un-normalized; policy lanes get the batch log-softmax.
        out_ref[...] = jnp.where(is_val_lane, logits, logits - lse).astype(out_ref.dtype)


def actor_critic_forward(x, params, *, block_rows=256):
    """x: (B, in_size) f32.  Returns (val (B, 1), log_pi (B, out_size))."""
    w1, b1, w2, b2, wv, bv, wp, bp = params
    B, in_size = x.shape
    hidden = w1.shape[1]
    out_size = wp.shape[1]
    if out_size + 1 > _LANES:
        # TODO(synk): tile the fused head across lanes if out_size >= 128.
        raise NotImplementedError("fused head assumes out_size + 1 <= 128")

    # Fuse the value head into the policy head, padded to a lane-dense 128-wide slab.
    wpf = (jnp.zeros((hidden, _LANES), jnp.float32)
           .at[:, :out_size].set(wp.astype(jnp.float32))
           .at[:, out_size].set(wv[:, 0].astype(jnp.float32)))
    bpf = (jnp.zeros((1, _LANES), jnp.float32)
           .at[:, :out_size].set(bp.astype(jnp.float32))
           .at[:, out_size].set(bv[:, 0].astype(jnp.float32)))

    # Batch tiling: TM rows per grid step (multiple of 8 sublanes). At these sizes the
    # double-buffered x tile + output slab are far below the scoped VMEM limit on
    # v5e/v6e/v7x, so no vmem_limit_bytes override is needed.
    tm = min(_round_up(block_rows, 8), _round_up(B, 8))
    b_pad = _round_up(B, tm)
    num_tiles = b_pad // tm
    xp = x if b_pad == B else jnp.pad(x, ((0, b_pad - B), (0, 0)))

    def const_spec(shape):  # weights/biases: VMEM-resident across all grid steps
        return pl.BlockSpec(shape, lambda p, i: (0, 0))

    kernel = functools.partial(_actor_critic_kernel, out_size=out_size,
                               valid_rows=B, tile_rows=tm)

    slab = pl.pallas_call(
        kernel,
        out_shape=jax.ShapeDtypeStruct((b_pad, _LANES), jnp.float32),
        grid_spec=pltpu.PrefetchScalarGridSpec(
            num_scalar_prefetch=0,
            grid=(2, num_tiles),                                      # (pass, batch tile)
            in_specs=[
                pl.BlockSpec((tm, in_size), lambda p, i: (i, 0)),     # x: streamed per tile
                const_spec((in_size, hidden)),                        # w1
                const_spec((1, hidden)),                              # b1
                const_spec((hidden, hidden)),                         # w2
                const_spec((1, hidden)),                              # b2
                const_spec((hidden, _LANES)),                         # fused [pi | val] weights
                const_spec((1, _LANES)),                              # fused [pi | val] bias
            ],
            out_specs=pl.BlockSpec((tm, _LANES), lambda p, i: (i, 0)),
            scratch_shapes=[pltpu.VMEM((1, _LANES), jnp.float32),     # running per-lane max
                            pltpu.VMEM((1, _LANES), jnp.float32)],    # running per-lane sum-exp
        ),
        compiler_params=pltpu.CompilerParams(
            # Must be sequential: pass 0 accumulates softmax stats across tiles and
            # pass 1 depends on all of pass 0 (batch-axis softmax couples the tiles).
            dimension_semantics=("arbitrary", "arbitrary"),
        ),
    )(xp, w1, b1, w2, b2, wpf, bpf)

    val = slab[:B, out_size:out_size + 1]
    log_pi = slab[:B, :out_size]
    return val, log_pi


def init_params(key, in_size, out_size, num_hidden=64):
    """Deterministic init mimicking torch.nn.Linear (uniform +/- 1/sqrt(fan_in)).
    Weights stored transposed relative to PyTorch: shape (fan_in, fan_out).
    Biases stored as (1, fan_out)."""
    def linear(key, fan_in, fan_out):
        kw, kb = jax.random.split(key)
        bound = 1.0 / jnp.sqrt(jnp.float32(fan_in))
        w = jax.random.uniform(kw, (fan_in, fan_out), jnp.float32, -bound, bound)
        b = jax.random.uniform(kb, (1, fan_out), jnp.float32, -bound, bound)
        return w, b

    k1, k2, k3, k4 = jax.random.split(key, 4)
    w1, b1 = linear(k1, in_size, num_hidden)
    w2, b2 = linear(k2, num_hidden, num_hidden)
    wv, bv = linear(k3, num_hidden, 1)
    wp, bp = linear(k4, num_hidden, out_size)
    return (w1, b1, w2, b2, wv, bv, wp, bp)


def _reference_forward(x, params):
    """Pure-JAX reference mirroring the PyTorch module."""
    w1, b1, w2, b2, wv, bv, wp, bp = params
    h = jnp.maximum(x @ w1 + b1, 0.0)
    h = jnp.maximum(h @ w2 + b2, 0.0)
    val = h @ wv + bv
    logits = h @ wp + bp
    log_pi = jax.nn.log_softmax(logits, axis=0)   # dim=0, same as the PyTorch code
    return val, log_pi


if __name__ == "__main__":
    key = jax.random.PRNGKey(0)
    kparam, kx = jax.random.split(key)

    in_size, out_size, num_hidden = 16, 6, 64
    params = init_params(kparam, in_size, out_size, num_hidden)

    # Two configs: single tile (no padding) and multi-tile with batch padding, both
    # checked against the pure-JAX reference (batch-wide log-softmax).
    for batch, block_rows in ((8, 256), (200, 64)):
        kx, sub = jax.random.split(kx)
        x = jax.random.normal(sub, (batch, in_size), jnp.float32)

        val, log_pi = actor_critic_forward(x, params, block_rows=block_rows)
        val = jax.block_until_ready(val)
        log_pi = jax.block_until_ready(log_pi)

        val_ref, log_pi_ref = _reference_forward(x, params)
        assert val.shape == (batch, 1) and log_pi.shape == (batch, out_size)
        assert jnp.allclose(val, val_ref, atol=1e-4, rtol=1e-4)
        assert jnp.allclose(log_pi, log_pi_ref, atol=1e-4, rtol=1e-4)

    print("KERNEL_OK")
</pallas_src>

<mosaic_0001>
module attributes {stable_mosaic.version = 11 : i64} {
  func.func @_actor_critic_kernel(%arg0: i32, %arg1: i32, %arg2: memref<8x16xf32, #tpu.memory_space<vmem>>, %arg3: memref<16x64xf32, #tpu.memory_space<vmem>>, %arg4: memref<1x64xf32, #tpu.memory_space<vmem>>, %arg5: memref<64x64xf32, #tpu.memory_space<vmem>>, %arg6: memref<1x64xf32, #tpu.memory_space<vmem>>, %arg7: memref<64x128xf32, #tpu.memory_space<vmem>>, %arg8: memref<1x128xf32, #tpu.memory_space<vmem>>, %arg9: memref<8x128xf32, #tpu.memory_space<vmem>>, %arg10: memref<1x128xf32, #tpu.memory_space<vmem>>, %arg11: memref<1x128xf32, #tpu.memory_space<vmem>>) attributes {dimension_semantics = [#tpu.dimension_semantics<arbitrary>, #tpu.dimension_semantics<arbitrary>], iteration_bounds = array<i64: 2, 1>, scalar_prefetch = 0 : i64, scratch_operands = 2 : i64, tpu.core_type = #tpu.core_type<tc>, window_params = [{transform_indices = @transform_0, window_bounds = array<i64: 8, 16>}, {pipeline_mode = #tpu.pipeline_mode<synchronous>, transform_indices = @transform_1, window_bounds = array<i64: 16, 64>}, {pipeline_mode = #tpu.pipeline_mode<synchronous>, transform_indices = @transform_2, window_bounds = array<i64: 1, 64>}, {pipeline_mode = #tpu.pipeline_mode<synchronous>, transform_indices = @transform_3, window_bounds = array<i64: 64, 64>}, {pipeline_mode = #tpu.pipeline_mode<synchronous>, transform_indices = @transform_4, window_bounds = array<i64: 1, 64>}, {pipeline_mode = #tpu.pipeline_mode<synchronous>, transform_indices = @transform_5, window_bounds = array<i64: 64, 128>}, {pipeline_mode = #tpu.pipeline_mode<synchronous>, transform_indices = @transform_6, window_bounds = array<i64: 1, 128>}, {transform_indices = @transform_7, window_bounds = array<i64: 8, 128>}]} {
    %c0 = arith.constant 0 : index
    %c0_0 = arith.constant 0 : index
    %0 = vector.load %arg2[%c0, %c0_0] : memref<8x16xf32, #tpu.memory_space<vmem>>, vector<8x16xf32>
    %c0_1 = arith.constant 0 : index
    %c0_2 = arith.constant 0 : index
    %1 = vector.load %arg3[%c0_1, %c0_2] : memref<16x64xf32, #tpu.memory_space<vmem>>, vector<16x64xf32>
    %cst = arith.constant dense<0.000000e+00> : vector<8x64xf32>
    %2 = tpu.matmul %0, %1, %cst {dimension_numbers = #tpu.dot_dimension_numbers<[1], [0], [0], [1], [0, 0, 1, 1], [], []>} : vector<8x16xf32>, vector<16x64xf32>, vector<8x64xf32> -> vector<8x64xf32>
    %c0_3 = arith.constant 0 : index
    %c0_4 = arith.constant 0 : index
    %3 = vector.load %arg4[%c0_3, %c0_4] : memref<1x64xf32, #tpu.memory_space<vmem>>, vector<1x64xf32>
    %4 = vector.broadcast %3 : vector<1x64xf32> to vector<8x64xf32>
    %5 = arith.addf %2, %4 : vector<8x64xf32>
    %cst_5 = arith.constant 0.000000e+00 : f32
    %6 = vector.broadcast %cst_5 : f32 to vector<8x64xf32>
    %7 = arith.maximumf %5, %6 : vector<8x64xf32>
    %c0_6 = arith.constant 0 : index
    %c0_7 = arith.constant 0 : index
    %8 = vector.load %arg5[%c0_6, %c0_7] : memref<64x64xf32, #tpu.memory_space<vmem>>, vector<64x64xf32>
    %cst_8 = arith.constant dense<0.000000e+00> : vector<8x64xf32>
    %9 = tpu.matmul %7, %8, %cst_8 {dimension_numbers = #tpu.dot_dimension_numbers<[1], [0], [0], [1], [0, 0, 1, 1], [], []>} : vector<8x64xf32>, vector<64x64xf32>, vector<8x64xf32> -> vector<8x64xf32>
    %c0_9 = arith.constant 0 : index
    %c0_10 = arith.constant 0 : index
    %10 = vector.load %arg6[%c0_9, %c0_10] : memref<1x64xf32, #tpu.memory_space<vmem>>, vector<1x64xf32>
    %11 = vector.broadcast %10 : vector<1x64xf32> to vector<8x64xf32>
    %12 = arith.addf %9, %11 : vector<8x64xf32>
    %cst_11 = arith.constant 0.000000e+00 : f32
    %13 = vector.broadcast %cst_11 : f32 to vector<8x64xf32>
    %14 = arith.maximumf %12, %13 : vector<8x64xf32>
    %c0_12 = arith.constant 0 : index
    %c0_13 = arith.constant 0 : index
    %15 = vector.load %arg7[%c0_12, %c0_13] : memref<64x128xf32, #tpu.memory_space<vmem>>, vector<64x128xf32>
    %cst_14 = arith.constant dense<0.000000e+00> : vector<8x128xf32>
    %16 = tpu.matmul %14, %15, %cst_14 {dimension_numbers = #tpu.dot_dimension_numbers<[1], [0], [0], [1], [0, 0, 1, 1], [], []>} : vector<8x64xf32>, vector<64x128xf32>, vector<8x128xf32> -> vector<8x128xf32>
    %c0_15 = arith.constant 0 : index
    %c0_16 = arith.constant 0 : index
    %17 = vector.load %arg8[%c0_15, %c0_16] : memref<1x128xf32, #tpu.memory_space<vmem>>, vector<1x128xf32>
    %18 = vector.broadcast %17 : vector<1x128xf32> to vector<8x128xf32>
    %19 = arith.addf %16, %18 : vector<8x128xf32>
    %20 = tpu.iota {dimensions = array<i32: 0>} : vector<8x128xi32>
    %c8_i32 = arith.constant 8 : i32
    %21 = arith.muli %arg1, %c8_i32 : i32
    %22 = vector.broadcast %21 : i32 to vector<8x128xi32>
    %23 = arith.addi %20, %22 : vector<8x128xi32>
    %c8_i32_17 = arith.constant 8 : i32
    %24 = vector.broadcast %c8_i32_17 : i32 to vector<8x128xi32>
    %25 = arith.cmpi slt, %23, %24 : vector<8x128xi32>
    %c0_i32 = arith.constant 0 : i32
    %26 = arith.cmpi eq, %arg0, %c0_i32 : i32
    %c0_i32_18 = arith.constant 0 : i32
    %27 = arith.cmpi eq, %arg1, %c0_i32_18 : i32
    %28 = arith.andi %26, %27 : i1
    %29 = arith.extui %28 : i1 to i32
    %c0_i32_19 = arith.constant 0 : i32
    %30 = arith.cmpi ne, %29, %c0_i32_19 : i32
    scf.if %30 {
      %cst_23 = arith.constant 0xFF800000 : f32
      %37 = vector.broadcast %cst_23 : f32 to vector<1x128xf32>
      %c0_24 = arith.constant 0 : index
      %c0_25 = arith.constant 0 : index
      %38 = vector.load %arg10[%c0_24, %c0_25] : memref<1x128xf32, #tpu.memory_space<vmem>>, vector<1x128xf32>
      tpu.vector_store %arg10[%c0_24, %c0_25], %37 {strides = array<i32>} : memref<1x128xf32, #tpu.memory_space<vmem>>, vector<1x128xf32>,
      %cst_26 = arith.constant 0.000000e+00 : f32
      %39 = vector.broadcast %cst_26 : f32 to vector<1x128xf32>
      %c0_27 = arith.constant 0 : index
      %c0_28 = arith.constant 0 : index
      %40 = vector.load %arg11[%c0_27, %c0_28] : memref<1x128xf32, #tpu.memory_space<vmem>>, vector<1x128xf32>
      tpu.vector_store %arg11[%c0_27, %c0_28], %39 {strides = array<i32>} : memref<1x128xf32, #tpu.memory_space<vmem>>, vector<1x128xf32>,
    } else {
    }
    %c0_i32_20 = arith.constant 0 : i32
    %31 = arith.cmpi eq, %arg0, %c0_i32_20 : i32
    %32 = arith.extui %31 : i1 to i32
    %c0_i32_21 = arith.constant 0 : i32
    %33 = arith.cmpi ne, %32, %c0_i32_21 : i32
    scf.if %33 {
      %cst_23 = arith.constant 0xFF800000 : f32
      %37 = vector.broadcast %cst_23 : f32 to vector<8x128xf32>
      %38 = arith.select %25, %19, %37 : vector<8x128xi1>, vector<8x128xf32>
      %cst_24 = arith.constant dense<0xFF800000> : vector<128xf32>
      %39 = vector.multi_reduction <maximumf>, %38, %cst_24 [0] : vector<8x128xf32> to vector<128xf32>
      %40 = vector.shape_cast %39 : vector<128xf32> to vector<1x128xf32>
      %c0_25 = arith.constant 0 : index
      %c0_26 = arith.constant 0 : index
      %41 = vector.load %arg10[%c0_25, %c0_26] : memref<1x128xf32, #tpu.memory_space<vmem>>, vector<1x128xf32>
      %42 = arith.maximumf %41, %40 : vector<1x128xf32>
      %c0_27 = arith.constant 0 : index
      %c0_28 = arith.constant 0 : index
      %43 = vector.load %arg11[%c0_27, %c0_28] : memref<1x128xf32, #tpu.memory_space<vmem>>, vector<1x128xf32>
      %c0_29 = arith.constant 0 : index
      %c0_30 = arith.constant 0 : index
      %44 = vector.load %arg10[%c0_29, %c0_30] : memref<1x128xf32, #tpu.memory_space<vmem>>, vector<1x128xf32>
      %45 = arith.subf %44, %42 : vector<1x128xf32>
      %46 = math.exp %45 : vector<1x128xf32>
      %47 = arith.mulf %43, %46 : vector<1x128xf32>
      %48 = vector.broadcast %42 : vector<1x128xf32> to vector<8x128xf32>
      %49 = arith.subf %38, %48 : vector<8x128xf32>
      %50 = math.exp %49 : vector<8x128xf32>
      %cst_31 = arith.constant dense<0.000000e+00> : vector<128xf32>
      %51 = vector.multi_reduction <add>, %50, %cst_31 [0] : vector<8x128xf32> to vector<128xf32>
      %52 = vector.shape_cast %51 : vector<128xf32> to vector<1x128xf32>
      %53 = arith.addf %47, %52 : vector<1x128xf32>
      %c0_32 = arith.constant 0 : index
      %c0_33 = arith.constant 0 : index
      %54 = vector.load %arg11[%c0_32, %c0_33] : memref<1x128xf32, #tpu.memory_space<vmem>>, vector<1x128xf32>
      tpu.vector_store %arg11[%c0_32, %c0_33], %53 {strides = array<i32>} : memref<1x128xf32, #tpu.memory_space<vmem>>, vector<1x128xf32>,
      %c0_34 = arith.constant 0 : index
      %c0_35 = arith.constant 0 : index
      %55 = vector.load %arg10[%c0_34, %c0_35] : memref<1x128xf32, #tpu.memory_space<vmem>>, vector<1x128xf32>
      tpu.vector_store %arg10[%c0_34, %c0_35], %42 {strides = array<i32>} : memref<1x128xf32, #tpu.memory_space<vmem>>, vector<1x128xf32>,
    } else {
    }
    %c1_i32 = arith.constant 1 : i32
    %34 = arith.cmpi eq, %arg0, %c1_i32 : i32
    %35 = arith.extui %34 : i1 to i32
    %c0_i32_22 = arith.constant 0 : i32
    %36 = arith.cmpi ne, %35, %c0_i32_22 : i32
    scf.if %36 {
      %c0_23 = arith.constant 0 : index
      %c0_24 = arith.constant 0 : index
      %37 = vector.load %arg10[%c0_23, %c0_24] : memref<1x128xf32, #tpu.memory_space<vmem>>, vector<1x128xf32>
      %c0_25 = arith.constant 0 : index
      %c0_26 = arith.constant 0 : index
      %38 = vector.load %arg11[%c0_25, %c0_26] : memref<1x128xf32, #tpu.memory_space<vmem>>, vector<1x128xf32>
      %39 = math.log %38 : vector<1x128xf32>
      %40 = arith.addf %37, %39 : vector<1x128xf32>
      %41 = tpu.iota {dimensions = array<i32: 1>} : vector<8x128xi32>
      %c6_i32 = arith.constant 6 : i32
      %42 = vector.broadcast %c6_i32 : i32 to vector<8x128xi32>
      %43 = arith.cmpi eq, %41, %42 : vector<8x128xi32>
      %44 = vector.broadcast %40 : vector<1x128xf32> to vector<8x128xf32>
      %45 = arith.subf %19, %44 : vector<8x128xf32>
      %46 = arith.select %43, %19, %45 : vector<8x128xi1>, vector<8x128xf32>
      %c0_27 = arith.constant 0 : index
      %c0_28 = arith.constant 0 : index
      %47 = vector.load %arg9[%c0_27, %c0_28] : memref<8x128xf32, #tpu.memory_space<vmem>>, vector<8x128xf32>
      tpu.vector_store %arg9[%c0_27, %c0_28], %46 {strides = array<i32>} : memref<8x128xf32, #tpu.memory_space<vmem>>, vector<8x128xf32>,
    } else {
    }
    return
  }
  func.func @transform_0(%arg0: i32, %arg1: i32) -> (i32, i32) {
    %c0_i32 = arith.constant 0 : i32
    %c0_i32_0 = arith.constant 0 : i32
    return %arg1, %c0_i32 : i32, i32
  }
  func.func @transform_1(%arg0: i32, %arg1: i32) -> (i32, i32) {
    %c0_i32 = arith.constant 0 : i32
    %c0_i32_0 = arith.constant 0 : i32
    %c0_i32_1 = arith.constant 0 : i32
    return %c0_i32, %c0_i32_0 : i32, i32
  }
  func.func @transform_2(%arg0: i32, %arg1: i32) -> (i32, i32) {
    %c0_i32 = arith.constant 0 : i32
    %c0_i32_0 = arith.constant 0 : i32
    %c0_i32_1 = arith.constant 0 : i32
    return %c0_i32, %c0_i32_0 : i32, i32
  }
  func.func @transform_3(%arg0: i32, %arg1: i32) -> (i32, i32) {
    %c0_i32 = arith.constant 0 : i32
    %c0_i32_0 = arith.constant 0 : i32
    %c0_i32_1 = arith.constant 0 : i32
    return %c0_i32, %c0_i32_0 : i32, i32
  }
  func.func @transform_4(%arg0: i32, %arg1: i32) -> (i32, i32) {
    %c0_i32 = arith.constant 0 : i32
    %c0_i32_0 = arith.constant 0 : i32
    %c0_i32_1 = arith.constant 0 : i32
    return %c0_i32, %c0_i32_0 : i32, i32
  }
  func.func @transform_5(%arg0: i32, %arg1: i32) -> (i32, i32) {
    %c0_i32 = arith.constant 0 : i32
    %c0_i32_0 = arith.constant 0 : i32
    %c0_i32_1 = arith.constant 0 : i32
    return %c0_i32, %c0_i32_0 : i32, i32
  }
  func.func @transform_6(%arg0: i32, %arg1: i32) -> (i32, i32) {
    %c0_i32 = arith.constant 0 : i32
    %c0_i32_0 = arith.constant 0 : i32
    %c0_i32_1 = arith.constant 0 : i32
    return %c0_i32, %c0_i32_0 : i32, i32
  }
  func.func @transform_7(%arg0: i32, %arg1: i32) -> (i32, i32) {
    %c0_i32 = arith.constant 0 : i32
    %c0_i32_0 = arith.constant 0 : i32
    return %arg1, %c0_i32 : i32, i32
  }
}

</mosaic_0001>

<bundles_post_ra>
// kernel: tpu_custom_call.1
= control target key start
LH: loop header
LB: loop body
LE: loop exit
PB: predicated region body
PF: predicated region fallthrough
CT: control target
= control target key end

     0   :  { %12 = vsyncpa [#allocation5], 0  ;;  %s1037_s0 = inlined_call_operand.hbm [shape: f32[8,16], index: 0, kind: input, shape index: {}]   ;;  %s1038_s1 = inlined_call_operand.hbm [shape: f32[16,64], index: 1, kind: input, shape index: {}]   ;;  %s1039_s2 = inlined_call_operand.vmem [shape: f32[1,64], index: 2, kind: input, shape index: {}]   ;;  %s1040_s3 = inlined_call_operand.hbm [shape: f32[64,64], index: 3, kind: input, shape index: {}]   ;;  %s1041_s4 = inlined_call_operand.vmem [shape: f32[1,64], index: 4, kind: input, shape index: {}]   ;;  %s1042_s5 = inlined_call_operand.hbm [shape: f32[64,128], index: 5, kind: input, shape index: {}]   ;;  %s1043_s6 = inlined_call_operand.vmem [shape: f32[1,128], index: 6, kind: input, shape index: {}]   ;;  %s1044_s7 = inlined_call_operand.hbm [shape: f32[8,128], index: 7, kind: output, shape index: {}]  }
   0x1   :  { %13 = vsyncpa [#allocation8], 0 }
   0x2   :  { %14 = vsyncpa [#allocation11], 0 }
   0x3   :  { %15 = vsyncpa [#allocation6], 0  ;;  %s938_s24 = smov 0   ;;  %s940_s25 = smov 0  }
   0x4   :  { %s942_s26 = smov 0  }
   0x5 LB: > { %s241_s29 = sshll.u32 %s1038_s1, 4  ;;  %s594_s30 = sadd.s32 4294967295, %s887_s26   ;;  %s887_s26 = sphi %s942_s26, %s21_s26   ;;  %s883_s25 = sphi %s940_s25, %s1049_s25   ;;  %s879_s24 = sphi %s938_s24, %s1048_s24   ;;  %s242_s29 = int_to_ptr.hbm [resolvable:$true] %s241_s29 }
   0x6   : > { %p595_p0 = scmp.ge.s32.totalorder %s887_s26, 1  ;;  %p216_p1 = scmp.lt.s32.totalorder %s887_s26, 3 }
   0x7   : > { %p961_p2 = scmp.eq.s32.totalorder %s594_s30, 0  ;;  %s889_s10 = smov [#allocation7]  }
   0x8   : > { %p965_p3 = pnand %p595_p0, %p216_p1  ;;  %s243_s11 = sshll.u32 %s889_s10, 4  ;;  %s244_s11 = int_to_ptr.vmem [resolvable:$true] %s243_s11 }
   0x9   : > { %s33_s13 = sadd.s32 1, %s883_s25  ;;  %s890_s14 = smov 128  }
   0xa   : > { %p636_p4 = pneg %p965_p3  ;;  %p35_p6 = scmp.ge.s32.totalorder %s33_s13, 2 }
   0xb   : > { %s891_s15 = smov 8   ;;  %s230_s18 = sshll.u32 %s1037_s0, 4  ;;  %s231_s18 = int_to_ptr.hbm [resolvable:$true] %s230_s18 }
   0xc   : > { %p973_p5 = pnand %p961_p2, %p636_p4  ;;  %s1051_s13 = smov (%p35_p6, %s33_s13), 0 }
   0xd   : > { %s892_s19 = smov [#allocation4]   ;;  %s258_s23 = sshll.u32 %s1040_s3, 4  ;;  %s259_s23 = int_to_ptr.hbm [resolvable:$true] %s258_s23 }
   0xe   : > { %642 = dma.hbm_to_vmem [thread:$0]  (!%p973_p5), %s242_s29, 256, %s244_s11, [#allocation8], %s890_s14, %s890_s14, %s891_s15  }
   0xf   : > { %s232_s20 = sshll.u32 %s892_s19, 4  ;;  %s893_s27 = smov [#allocation9]   ;;  %s233_s20 = int_to_ptr.vmem [resolvable:$true] %s232_s20 }
  0x10   : > { %639 = dma.hbm_to_vmem [thread:$0]  (!%p973_p5), %s231_s18, 128, %s233_s20, [#allocation5]  }
  0x11   : > { %s260_s28 = sshll.u32 %s893_s27, 4  ;;  %s275_s11 = sshll.u32 %s1042_s5, 4  ;;  %s261_s28 = int_to_ptr.vmem [resolvable:$true] %s260_s28  ;;  %s276_s11 = int_to_ptr.hbm [resolvable:$true] %s275_s11 }
  0x12   : > { %645 = dma.hbm_to_vmem [thread:$0]  (!%p973_p5), %s259_s23, 1024, %s261_s28, [#allocation8], %s890_s14, %s890_s14, %s891_s15  }
  0x13   : > { %s894_s16 = smov [#allocation10]   ;;  %296 = sbr.rel (%p965_p3) target bundleno = 506 (0x1fa), region = 48 }
  0x14   : > { %s277_s17 = sshll.u32 %s894_s16, 4  ;;  %s278_s17 = int_to_ptr.vmem [resolvable:$true] %s277_s17 }
  0x15   : > { %648 = dma.hbm_to_vmem [thread:$0]  (!%p973_p5), %s276_s11, 1024, %s278_s17, [#allocation11], %s890_s14, %s890_s14, %s891_s15  }
  0x18   : > { %862 = dma.done.wait (%p961_p2), [#allocation5], 128  }
  0x19   : > { %864 = vsyncadd (%p961_p2), [#allocation5], 4294967168 }
  0x1a   : > { %866 = dma.done.wait (%p961_p2), [#allocation8], 1280  }
  0x1b   : > { %868 = vsyncadd (%p961_p2), [#allocation8], 4294966016 }
  0x1c   : > { %870 = dma.done.wait (%p961_p2), [#allocation11], 1024  }
  0x1d   : > { %872 = vsyncadd (%p961_p2), [#allocation11], 4294966272  ;;  %v336_v0 = vld [vmem:[#allocation7 + $0x8] sm:$0xff]  ;;  %v335_v1 = vld [vmem:[#allocation7] sm:$0xff]  ;;  %vm341_vm0 = vcmask 130048   ;;  %vm378_vm1 = vcmask 523264  }
  0x1e   : > { %359 = vmatpush.msra.mxu0 %v336_v0  ;;  %v334_v2 = vld [vmem:[#allocation4] sm:$0xff]  ;;  %v373_v3 = vld [vmem:[#allocation9 + $0x38] sm:$0xff]  ;;  %v372_v4 = vld [vmem:[#allocation9 + $0x30] sm:$0xff]  ;;  %p444_p7 = scmp.eq.s32.totalorder %s879_s24, 0 }
  0x1f   : > { %390 = vmatpush.msra.mxu1 %v373_v3  ;;  %v371_v5 = vld [vmem:[#allocation9 + $0x28] sm:$0xff]  ;;  %v370_v6 = vld [vmem:[#allocation9 + $0x20] sm:$0xff]  ;;  %v369_v7 = vld [vmem:[#allocation9 + $0x18] sm:$0xff]  ;;  %v895_v30 = vmov (%p444_p7), -inf   ;;  %v896_v31 = vmov (%p444_p7), 0.0  }
  0x20   : > { %360 = vmatpush.msra.mxu0 %v335_v1  ;;  %v368_v8 = vld [vmem:[#allocation9 + $0x10] sm:$0xff]  ;;  %v367_v9 = vld [vmem:[#allocation9 + $0x8] sm:$0xff]  ;;  %v366_v10 = vld [vmem:[#allocation9] sm:$0xff]  ;;  %450 = vst [vmem:[#allocation2] sm:$0x1] (%p444_p7), %v895_v30 }
  0x21   : > { %605 = vmatmul.msk.f32.vlgmr.msra.gmra.mxu0 %vm341_vm0, %v334_v2  ;;  %391 = vmatpush.msra.mxu1 %v372_v4  ;;  %v410_v11 = vld [vmem:[#allocation10 + $0x38] sm:$0xff]  ;;  %v409_v12 = vld [vmem:[#allocation10 + $0x30] sm:$0xff]  ;;  %v408_v13 = vld [vmem:[#allocation10 + $0x28] sm:$0xff]  ;;  %451 = vst [vmem:[#allocation3] sm:$0x1] (%p444_p7), %v896_v31 }
  0x22   : > { %426 = vmatpush.msra.mxu2 %v410_v11  ;;  %v407_v14 = vld [vmem:[#allocation10 + $0x20] sm:$0xff]  ;;  %v406_v15 = vld [vmem:[#allocation10 + $0x18] sm:$0xff]  ;;  %v405_v20 = vld [vmem:[#allocation10 + $0x10] sm:$0xff] }
  0x23   : > { %392 = vmatpush.msra.mxu1 %v371_v5  ;;  %v692_v16 = vld [vmem:[%s1039_s2] ss:$0 sm:$0xff]  ;;  %v404_v21 = vld [vmem:[#allocation10 + $0x8] sm:$0xff] }
  0x24   : > { %427 = vmatpush.msra.mxu2 %v409_v12  ;;  %v403_v22 = vld [vmem:[#allocation10] sm:$0xff] }
  0x25   : > { %393 = vmatpush.msra.mxu1 %v370_v6  ;;  %v693_v23 = vld [vmem:[%s1041_s4] ss:$0 sm:$0xff] }
  0x26   : > { %428 = vmatpush.msra.mxu2 %v408_v13  ;;  %v694_v27 = vld [vmem:[%s1043_s6] ss:$0 sm:$0xff] }
  0x27   : > { %394 = vmatpush.msra.mxu1 %v369_v7 }
  0x28   : > { %429 = vmatpush.msra.mxu2 %v407_v14 }
  0x29   : > { %395 = vmatpush.msra.mxu1 %v368_v8 }
  0x2a   : > { %430 = vmatpush.msra.mxu2 %v406_v15 }
  0x2b   : > { %396 = vmatpush.msra.mxu1 %v367_v9 }
  0x2c   : > { %431 = vmatpush.msra.mxu2 %v405_v20 }
  0x2d   : > { %397 = vmatpush.msra.mxu1 %v366_v10 }
  0x2e   : > { %432 = vmatpush.msra.mxu2 %v404_v21 }
  0x30   : > { %433 = vmatpush.msra.mxu2 %v403_v22 }
  0x9e   : > { %v362_v17 = vpop.f32.mrf.mxu0 }
  0x9f   : > { %v363_v18 = vadd.f32 %v692_v16, %v362_v17 }
  0xa1   : > { %v365_v19 = vmax.f32 %v363_v18, 0.0 }
  0xa3   : > { %606 = vmatmul.msk.f32.vlgmr.msra.gmra.mxu1 %vm378_vm1, %v365_v19 }
 0x120   : > { %v399_v24 = vpop.f32.mrf.mxu1 }
 0x121   : > { %v400_v25 = vadd.f32 %v693_v23, %v399_v24 }
 0x123   : > { %v402_v26 = vmax.f32 %v400_v25, 0.0 }
 0x125   : > { %607 = vmatmul.msk.f32.vlgmr.msra.gmra.mxu2 %vm378_vm1, %v402_v26 }
 0x1a5   : > { %449 = sbr.rel (!%p444_p7) target bundleno = 426 (0x1aa), region = 68 }
 0x1a8   : > { %v435_v28 = vpop.f32.mrf.mxu2 }
 0x1a9   : > { %v436_v29 = vadd.f32 %v694_v27, %v435_v28 }
 0x1aa PF: > { %p609_p8 = scmp.ne.s32.totalorder %s879_s24, 0 }
 0x1ac   : > { %454 = sbr.rel (%p609_p8) target bundleno = 475 (0x1db), region = 72 }
 0x1b1   : > { %v456_v32 = vrot.slane %v436_v29, 4  ;;  %v462_v37 = vld [vmem:[#allocation2] sm:$0x1]  ;;  %v464_v50 = vld [vmem:[#allocation3] sm:$0x1] }
 0x1b3   : > { %v457_v33 = vmax.f32 %v436_v29, %v456_v32 }
 0x1b5   : > { %v458_v34 = vrot.slane %v457_v33, 2 }
 0x1b7   : > { %v459_v35 = vmax.f32 %v457_v33, %v458_v34 }
 0x1b9   : > { %v460_v36 = vrot.slane %v459_v35, 1 }
 0x1bb   : > { %v461_v38 = vmax.f32 %v459_v35, %v460_v36 }
 0x1bd   : > { %v463_v39 = vmax.f32 %v462_v37, %v461_v38 }
 0x1bf   : > { %v470_v40 = vperm.slane %v463_v39, 0  ;;  %483 = vst [vmem:[#allocation2] sm:$0x1] %v463_v39  ;;  %v465_v42 = vsub.f32 %v462_v37, %v463_v39 }
 0x1c1   : > { %v472_v41 = vsub.f32 %v436_v29, %v470_v40  ;;  %v466_v44 = vmul.f32 1.442695, %v465_v42 }
 0x1c3   : > { %v473_v43 = vmul.f32 1.442695, %v472_v41 }
 0x1c5   : > { %695 = vpow2.f32 %v473_v43 }
 0x1c6   : > { %697 = vpow2.f32 %v466_v44 }
 0x1cb   : > { %v696_v45 = vpop.eup %695 }
 0x1cc   : > { %v475_v46 = vrot.slane %v696_v45, 4  ;;  %v698_v49 = vpop.eup %697 }
 0x1cd   : > { %v468_v52 = vmul.f32 %v698_v49, %v464_v50 }
 0x1ce   : > { %v476_v47 = vadd.f32 %v696_v45, %v475_v46 }
 0x1d0   : > { %v477_v48 = vrot.slane %v476_v47, 2 }
 0x1d2   : > { %v478_v51 = vadd.f32 %v477_v48, %v476_v47 }
 0x1d4   : > { %v479_v53 = vrot.slane %v478_v51, 1 }
 0x1d6   : > { %v480_v54 = vadd.f32 %v479_v53, %v478_v51 }
 0x1d8   : > { %v481_v55 = vadd.f32 %v480_v54, %v468_v52 }
 0x1da   : > { %482 = vst [vmem:[#allocation3] sm:$0x1] %v481_v55 }
 0x1db PF: > { %p610_p9 = scmp.ne.s32.totalorder %s879_s24, 1 }
 0x1dd   : > { %487 = sbr.rel (%p610_p9) target bundleno = 500 (0x1f4), region = 76 }
 0x1e2   : > { %v489_v56 = vld [vmem:[#allocation3] sm:$0x1]  ;;  %v493_v57 = vlaneseq  ;;  %v488_v59 = vld [vmem:[#allocation2] sm:$0x1] }
 0x1e3   : > { %699 = vlog2.f32 %v489_v56 }
 0x1e4   : > { %v494_v61 = vand.u32 127, %v493_v57 }
 0x1e6   : > { %vm495_vm2 = vcmp.eq.s32.totalorder %v494_v61, 6 }
 0x1e9   : > { %v700_v58 = vpop.eup %699 }
 0x1ea   : > { %v491_v60 = vmul.f32 0.6931472, %v700_v58 }
 0x1ec   : > { %v492_v62 = vadd.f32 %v491_v60, %v488_v59 }
 0x1ee   : > { %v497_v63 = vperm.slane %v492_v62, 0 }
 0x1f0   : > { %v499_v0 = vsub.f32 %v436_v29, %v497_v63 }
 0x1f2   : > { %v500_v1 = vsel %vm495_vm2, %v436_v29, %v499_v0 }
 0x1f3   : > { %501 = vst [vmem:[#allocation12] sm:$0xff] %v500_v1 }
 0x1f4 PF: > { %p657_p10 = scmp.eq.s32.totalorder %s594_s30, 1  ;;  %s512_s20 = sshll.u32 %s1044_s7, 4  ;;  %s513_s20 = int_to_ptr.hbm [resolvable:$true] %s512_s20 }
 0x1f5   : > { %s897_s21 = smov [#allocation12]  }
 0x1f6   : > { %s510_s22 = sshll.u32 %s897_s21, 4  ;;  %s511_s22 = int_to_ptr.vmem [resolvable:$true] %s510_s22 }
 0x1f7   : > { %633 = dma.vmem_to_hbm [thread:$0]  (%p657_p10), %s511_s22, 128, %s513_s20, [#allocation6]  }
 0x1f8   : > { %874 = dma.done.wait (%p657_p10), [#allocation6], 128  }
 0x1f9   : > { %876 = vsyncadd (%p657_p10), [#allocation6], 4294967168 }
 0x1fa PF: > { %s21_s26 = sadd.s32 1, %s887_s26   ;;  %s1048_s24 = smov %s883_s25 }
 0x1fb   : > { %p18_p11 = scmp.ge.s32.totalorder %s21_s26, 4   ;;  %s1049_s25 = smov %s1051_s13 }
 0x1fd   :  { %20 = sbr.rel (!%p18_p11) target bundleno = 5 (0x5), region = 103 }
 0x202   :  { %526 = vsyncpa [#allocation5], 1 }
 0x203   :  { %528 = vsyncpa [#allocation5 + $0x1], 1 }
 0x204   :  { %529 = vsyncpa [#allocation8], 1 }
 0x205   :  { %530 = vsyncpa [#allocation11], 1 }
 0x206   :  { %531 = vsyncpa [#allocation6], 1 }
 0x207   :  { %533 = vsyncpa [#allocation6 + $0x1], 1 }

</bundles_post_ra>
